<compile_context>
chip_gen: v7x
topology: tpu7x:2x2x1
jax: 0.10.0
libtpu: 0.0.40
codegen_flags: <defaults>
</compile_context>

<pallas_src>
import jax
import jax.numpy as jnp
from jax.experimental import pallas as pl
from jax.experimental.pallas import tpu as pltpu


def _upsample_fused_kernel(x_ref, w_ref, b_ref, e_ref, o_ref):
    # x_ref: (1, C_in, T)    T = band_rows * W flattened input pixels (whole rows)
    # w_ref: (C_out, C_in)   1x1-conv weight with BN scale folded in
    # b_ref: (C_out, 1)      folded BN bias
    # e_ref: (T, 4*T)        0/1 map: y @ E = column+row duplicated band, already in
    #                        the flat row-major order of the (2H, 2W) output
    # o_ref: (1, C_out, 4*T) output band (flat)
    y = jnp.dot(w_ref[...], x_ref[0], preferred_element_type=jnp.float32)   # (C_out, T)
    y = y + b_ref[...]                                                      # folded BN bias
    y = jnp.maximum(y, 0.1 * y)                                             # LeakyReLU(0.1)
    out = jnp.dot(y, e_ref[...], preferred_element_type=jnp.float32)        # (C_out, 4T)
    o_ref[0] = out.astype(o_ref.dtype)   # single lane-dense, aligned full-block store


def _pick_band_rows(H, W, C_in, C_out, budget_bytes):
    """Rows per band.

    Prefer the smallest divisor t of H (t < H) with (t*W) % 128 == 0, i.e. legal
    and lane-dense input/output blocks, minimal upsample MXU FLOPs and maximal
    grid parallelism.  Fall back to the whole image (full-dim blocks are always
    legal).
    """
    def tile_bytes(t):
        T = t * W
        return 4 * (
            2 * C_in * T             # double-buffered input band
            + 2 * C_out * 4 * T      # double-buffered fused (4x) output band
            + C_out * T              # f32 y intermediate
            + 2 * (C_out * C_in + C_out + T * 4 * T)  # weight / bias / E (conservative x2)
        )

    aligned = sorted(t for t in range(1, H) if H % t == 0 and (t * W) % 128 == 0)
    for t in aligned:                     # smallest aligned band that fits the budget
        if tile_bytes(t) <= budget_bytes:
            return t
    # TODO(synk): for unalignable widths (e.g. W=13/26/52), pad W to a 128-lane
    # multiple in the wrapper or add an in-kernel fori_loop group fallback; the
    # whole-image fallback below is legal but its E matrix grows as (HW, 4HW).
    return H


def upsample_forward(x_nchw, conv_w, gamma, beta, running_mean, running_var,
                     *, eps=1e-5, vmem_budget_bytes=6 << 20):
    """Forward pass of the Upsample module.

    x_nchw : (N, C_in, H, W) float32
    conv_w : (C_out, C_in, 1, 1) float32 (PyTorch Conv2d weight layout)
    returns: (N, C_out, 2H, 2W) float32
    """
    N, C_in, H, W = x_nchw.shape
    C_out = conv_w.shape[0]
    dtype = x_nchw.dtype

    # Fold eval-mode BatchNorm: scale into the weight, bias as a per-channel add.
    # TODO(synk): training-mode BN (batch statistics) is not reproduced here.
    scale = gamma / jnp.sqrt(running_var + eps)                 # (C_out,)
    w2d = conv_w.reshape(C_out, C_in) * scale[:, None]          # (C_out, C_in)
    bias = (beta - running_mean * scale).reshape(C_out, 1)      # (C_out, 1)

    th = _pick_band_rows(H, W, C_in, C_out, vmem_budget_bytes)  # rows per band, th | H
    T = th * W

    # Band duplication matrix: for output flat position p within a band,
    #   r = p // (4W)  (input row in band),  k = p % (2W),  j = k // 2  (input col)
    # so E[m, p] = 1  iff  m == W*r + j.  y @ E is the band fully upsampled
    # (columns and rows duplicated) in the flat row-major order of (2H, 2W).
    p = jnp.arange(4 * T)
    src = W * (p // (4 * W)) + (p % (2 * W)) // 2               # (4T,)
    e_band = (jnp.arange(T)[:, None] == src[None, :]).astype(dtype)   # (T, 4T)

    x_flat = x_nchw.reshape(N, C_in, H * W)                     # metadata-only reshape

    out_flat = pl.pallas_call(
        _upsample_fused_kernel,
        out_shape=jax.ShapeDtypeStruct((N, C_out, 4 * H * W), dtype),
        grid_spec=pltpu.PrefetchScalarGridSpec(
            num_scalar_prefetch=0,
            grid=(N, H // th),
            in_specs=[
                pl.BlockSpec((1, C_in, T), lambda n, i: (n, 0, i)),
                pl.BlockSpec((C_out, C_in), lambda n, i: (0, 0)),
                pl.BlockSpec((C_out, 1), lambda n, i: (0, 0)),
                pl.BlockSpec((T, 4 * T), lambda n, i: (0, 0)),
            ],
            out_specs=pl.BlockSpec((1, C_out, 4 * T), lambda n, i: (n, 0, i)),
        ),
        compiler_params=pltpu.CompilerParams(
            dimension_semantics=("parallel", "parallel"),
            vmem_limit_bytes=32 * 1024 * 1024),
    )(x_flat, w2d, bias, e_band)

    # Output bands were written already interleaved as (2h, 2h+1) row pairs, so
    # this reshape is metadata-only.
    return out_flat.reshape(N, C_out, 2 * H, 2 * W)


def _reference_forward(x_nchw, conv_w, gamma, beta, mean, var, eps=1e-5):
    # Pure-JAX reference for correctness checking.
    N, C_in, H, W = x_nchw.shape
    C_out = conv_w.shape[0]
    w2d = conv_w.reshape(C_out, C_in)
    y = jnp.einsum("nchw,oc->nohw", x_nchw, w2d)
    scale = (gamma / jnp.sqrt(var + eps)).reshape(1, C_out, 1, 1)
    bias = (beta - mean * gamma / jnp.sqrt(var + eps)).reshape(1, C_out, 1, 1)
    y = y * scale + bias
    y = jnp.where(y >= 0, y, 0.1 * y)
    y = jnp.repeat(jnp.repeat(y, 2, axis=2), 2, axis=3)
    return y


if __name__ == "__main__":
    key = jax.random.PRNGKey(0)
    k_x, k_w, k_g, k_b, k_m, k_v = jax.random.split(key, 6)

    N, C_in, C_out, H, W = 2, 4, 8, 16, 16

    x = jax.random.normal(k_x, (N, C_in, H, W), dtype=jnp.float32)
    conv_w = 0.1 * jax.random.normal(k_w, (C_out, C_in, 1, 1), dtype=jnp.float32)
    gamma = 1.0 + 0.1 * jax.random.normal(k_g, (C_out,), dtype=jnp.float32)
    beta = 0.1 * jax.random.normal(k_b, (C_out,), dtype=jnp.float32)
    running_mean = 0.1 * jax.random.normal(k_m, (C_out,), dtype=jnp.float32)
    running_var = jnp.abs(1.0 + 0.1 * jax.random.normal(k_v, (C_out,), dtype=jnp.float32))

    out = upsample_forward(x, conv_w, gamma, beta, running_mean, running_var)
    out = jax.block_until_ready(out)

    ref = _reference_forward(x, conv_w, gamma, beta, running_mean, running_var)
    assert out.shape == (N, C_out, 2 * H, 2 * W), out.shape
    assert jnp.allclose(out, ref, atol=1e-5, rtol=1e-5)

    print("KERNEL_OK")
</pallas_src>

<mosaic_0001>
module attributes {stable_mosaic.version = 11 : i64} {
  func.func @_upsample_fused_kernel(%arg0: i32, %arg1: i32, %arg2: memref<1x4x128xf32, #tpu.memory_space<vmem>>, %arg3: memref<8x4xf32, #tpu.memory_space<vmem>>, %arg4: memref<8x1xf32, #tpu.memory_space<vmem>>, %arg5: memref<128x512xf32, #tpu.memory_space<vmem>>, %arg6: memref<1x8x512xf32, #tpu.memory_space<vmem>>) attributes {dimension_semantics = [#tpu.dimension_semantics<parallel>, #tpu.dimension_semantics<parallel>], iteration_bounds = array<i64: 2, 2>, scalar_prefetch = 0 : i64, scratch_operands = 0 : i64, tpu.core_type = #tpu.core_type<tc>, window_params = [{transform_indices = @transform_0, window_bounds = array<i64: 1, 4, 128>}, {pipeline_mode = #tpu.pipeline_mode<synchronous>, transform_indices = @transform_1, window_bounds = array<i64: 8, 4>}, {pipeline_mode = #tpu.pipeline_mode<synchronous>, transform_indices = @transform_2, window_bounds = array<i64: 8, 1>}, {pipeline_mode = #tpu.pipeline_mode<synchronous>, transform_indices = @transform_3, window_bounds = array<i64: 128, 512>}, {transform_indices = @transform_4, window_bounds = array<i64: 1, 8, 512>}]} {
    %c0 = arith.constant 0 : index
    %c0_0 = arith.constant 0 : index
    %0 = vector.load %arg3[%c0, %c0_0] : memref<8x4xf32, #tpu.memory_space<vmem>>, vector<8x4xf32>
    %c0_1 = arith.constant 0 : index
    %c0_2 = arith.constant 0 : index
    %c0_3 = arith.constant 0 : index
    %1 = vector.load %arg2[%c0_1, %c0_2, %c0_3] : memref<1x4x128xf32, #tpu.memory_space<vmem>>, vector<1x4x128xf32>
    %2 = vector.shape_cast %1 : vector<1x4x128xf32> to vector<4x128xf32>
    %cst = arith.constant dense<0.000000e+00> : vector<8x128xf32>
    %3 = tpu.matmul %0, %2, %cst {dimension_numbers = #tpu.dot_dimension_numbers<[1], [0], [0], [1], [0, 0, 1, 1], [], []>} : vector<8x4xf32>, vector<4x128xf32>, vector<8x128xf32> -> vector<8x128xf32>
    %c0_4 = arith.constant 0 : index
    %c0_5 = arith.constant 0 : index
    %4 = vector.load %arg4[%c0_4, %c0_5] : memref<8x1xf32, #tpu.memory_space<vmem>>, vector<8x1xf32>
    %5 = vector.broadcast %4 : vector<8x1xf32> to vector<8x128xf32>
    %6 = arith.addf %3, %5 : vector<8x128xf32>
    %cst_6 = arith.constant 1.000000e-01 : f32
    %7 = vector.broadcast %cst_6 : f32 to vector<8x128xf32>
    %8 = arith.mulf %7, %6 : vector<8x128xf32>
    %9 = arith.maximumf %6, %8 : vector<8x128xf32>
    %c0_7 = arith.constant 0 : index
    %c0_8 = arith.constant 0 : index
    %10 = vector.load %arg5[%c0_7, %c0_8] : memref<128x512xf32, #tpu.memory_space<vmem>>, vector<128x512xf32>
    %cst_9 = arith.constant dense<0.000000e+00> : vector<8x512xf32>
    %11 = tpu.matmul %9, %10, %cst_9 {dimension_numbers = #tpu.dot_dimension_numbers<[1], [0], [0], [1], [0, 0, 1, 1], [], []>} : vector<8x128xf32>, vector<128x512xf32>, vector<8x512xf32> -> vector<8x512xf32>
    %c0_10 = arith.constant 0 : index
    %c0_11 = arith.constant 0 : index
    %c0_12 = arith.constant 0 : index
    %12 = vector.load %arg6[%c0_10, %c0_11, %c0_12] : memref<1x8x512xf32, #tpu.memory_space<vmem>>, vector<1x8x512xf32>
    %13 = vector.shape_cast %12 : vector<1x8x512xf32> to vector<8x512xf32>
    %14 = vector.shape_cast %11 : vector<8x512xf32> to vector<1x8x512xf32>
    tpu.vector_store %arg6[%c0_10, %c0_11, %c0_12], %14 {strides = array<i32>} : memref<1x8x512xf32, #tpu.memory_space<vmem>>, vector<1x8x512xf32>,
    return
  }
  func.func @transform_0(%arg0: i32, %arg1: i32) -> (i32, i32, i32) {
    %c0_i32 = arith.constant 0 : i32
    %c0_i32_0 = arith.constant 0 : i32
    return %arg0, %c0_i32, %arg1 : i32, i32, i32
  }
  func.func @transform_1(%arg0: i32, %arg1: i32) -> (i32, i32) {
    %c0_i32 = arith.constant 0 : i32
    %c0_i32_0 = arith.constant 0 : i32
    %c0_i32_1 = arith.constant 0 : i32
    return %c0_i32, %c0_i32_0 : i32, i32
  }
  func.func @transform_2(%arg0: i32, %arg1: i32) -> (i32, i32) {
    %c0_i32 = arith.constant 0 : i32
    %c0_i32_0 = arith.constant 0 : i32
    %c0_i32_1 = arith.constant 0 : i32
    return %c0_i32, %c0_i32_0 : i32, i32
  }
  func.func @transform_3(%arg0: i32, %arg1: i32) -> (i32, i32) {
    %c0_i32 = arith.constant 0 : i32
    %c0_i32_0 = arith.constant 0 : i32
    %c0_i32_1 = arith.constant 0 : i32
    return %c0_i32, %c0_i32_0 : i32, i32
  }
  func.func @transform_4(%arg0: i32, %arg1: i32) -> (i32, i32, i32) {
    %c0_i32 = arith.constant 0 : i32
    %c0_i32_0 = arith.constant 0 : i32
    return %arg0, %c0_i32, %arg1 : i32, i32, i32
  }
}

</mosaic_0001>

<bundles_post_ra>
// kernel: tpu_custom_call.1
= control target key start
LH: loop header
LB: loop body
LE: loop exit
PB: predicated region body
PF: predicated region fallthrough
CT: control target
= control target key end

     0   :  { %9 = vsyncpa [#allocation3], 0  ;;  %s1161_s0 = inlined_call_operand.vmem [shape: f32[2,4,256], index: 0, kind: input, shape index: {}]   ;;  %s1162_s1 = inlined_call_operand.vmem [shape: f32[8,4], index: 1, kind: input, shape index: {}]   ;;  %s1163_s2 = inlined_call_operand.vmem [shape: f32[8,1], index: 2, kind: input, shape index: {}]   ;;  %s1164_s3 = inlined_call_operand.hbm [shape: f32[128,512], index: 3, kind: input, shape index: {}]   ;;  %s1165_s4 = inlined_call_operand.hbm [shape: f32[2,8,1024], index: 4, kind: output, shape index: {}]  }
   0x1   :  { %10 = vsyncpa [#allocation4], 0 }
   0x2   :  { %12 = vsyncpa [#allocation4 + $0x1], 0  ;;  %s980_s15 = smov 0   ;;  %s982_s16 = smov 0  }
   0x3   :  { %s984_s17 = smov 0   ;;  %s986_s18 = smov 0  }
   0x4   :  { %s988_s19 = smov 0   ;;  %s990_s20 = smov 0  }
   0x5   :  { %s992_s21 = smov 0   ;;  %s994_s22 = smov 0  }
   0x6 LB: > { %s643_s23 = sadd.s32 4294967295, %s946_s22   ;;  %s644_s24 = sadd.s32 4294967294, %s946_s22   ;;  %s946_s22 = sphi %s994_s22, %s18_s22   ;;  %s942_s21 = sphi %s992_s21, %s1185_s21   ;;  %s938_s20 = sphi %s990_s20, %s1184_s20   ;;  %s934_s19 = sphi %s988_s19, %s1183_s19   ;;  %s930_s18 = sphi %s986_s18, %s1182_s18   ;;  %s926_s17 = sphi %s984_s17, %s1181_s17   ;;  %s922_s16 = sphi %s982_s16, %s1180_s16   ;;  %s918_s15 = sphi %s980_s15, %s1179_s15  }
   0x7   : > { %s27_s25 = sadd.s32 1, %s938_s20  ;;  %s30_s26 = sadd.s32 1, %s942_s21 }
   0x8   : > { %p28_p0 = scmp.ge.s32.totalorder %s27_s25, 2  ;;  %s130_s27 = sadd.s32 1, %s926_s17 }
   0x9   : > { %p140_p1 = scmp.ne.s32.totalorder %s926_s17, %s922_s16  ;;  %p141_p2 = scmp.eq.s32.totalorder %s643_s23, 3 }
   0xa   : > { %s1187_s25 = smov (%p28_p0, %s27_s25), 0  ;;  %s1189_s26 = smov (!%p28_p0, %s30_s26), %s942_s21 }
   0xb   : > { %s126_s28 = ssub.s32 %s938_s20, %s1187_s25  ;;  %p1032_p3 = por %p141_p2, %p140_p1 }
   0xc   : > { %p32_p4 = scmp.ge.s32.totalorder %s1189_s26, 2  ;;  %p146_p5 = scmp.ne.s32.totalorder %s922_s16, %s918_s15 }
   0xd   : > { %s1170_s29 = scalar_select %p1032_p3, 1, 0 }
   0xe   : > { %p147_p6 = scmp.eq.s32.totalorder %s644_s24, 3  ;;  %p645_p7 = scmp.ge.s32.totalorder %s946_s22, 1 }
   0xf   : > { %s1191_s26 = smov (%p32_p4, %s1189_s26), 0  ;;  %p154_p9 = scmp.lt.s32.totalorder %s946_s22, 5 }
  0x10   : > { %p1041_p8 = por %p147_p6, %p146_p5  ;;  %s125_s5 = ssub.s32 %s942_s21, %s1191_s26 }
  0x11   : > { %s127_s6 = sor.u32 %s126_s28, %s125_s5  ;;  %p1048_p10 = pnand %p645_p7, %p154_p9 }
  0x12   : > { %s1171_s30 = scalar_select %p1041_p8, 1, 0 }
  0x13   : > { %s1172_s7 = scalar_select %p1048_p10, 1, 0 }
  0x14   : > { %p128_p11 = scmp.eq.s32.totalorder %s127_s6, 0  ;;  %p1052_p12 = scmp.eq.s32.totalorder %s643_s23, 0 }
  0x15   : > { %p738_p13 = pneg %p1048_p10  ;;  %s948_s10 = smov [#allocation2]  }
  0x16   : > { %s1173_s8 = scalar_select %p1052_p12, 1, 0 }
  0x17   : > { %s1059_s9 = scalar_select %p128_p11, %s926_s17, %s130_s27  }
  0x18   : > { %s172_s11 = sshll.u32 %s948_s10, 4  ;;  %p1063_p0 = pnand %p1052_p12, %p738_p13  ;;  %s173_s11 = int_to_ptr.vmem [resolvable:$true] %s172_s11 }
  0x19   : > { %s820_s23 = scalar_lea.hbm %s1164_s3, 8192 }
  0x1a   : > { %p821_p1 = scmp.ne.s32.totalorder %s1164_s3, %s820_s23  ;;  %p822_p2 = pneg %p1063_p0 }
  0x1b   : > { %p827_p6 = scmp.lt.u32.totalorder %s820_s23, %s1164_s3 }
  0x1c   : > { %p823_p4 = pnand %p822_p2, %p821_p1 }
  0x1e   : > { %p824_p5 = pneg %p823_p4 }
  0x20   : > { %p829_p7 = pnand %p827_p6, %p824_p5 }
  0x22   : > { %832 = shalt.err (!%p829_p7)
}
  0x23   : > { %s833_s6 = scalar_lea.vmem %s173_s11, 8192  ;;  %p841_p8 = scmp.lt.s32.totalorder %s173_s11, %s173_s11 }
  0x24   : > { %p834_p9 = scmp.ne.s32.totalorder %s173_s11, %s833_s6  ;;  %p842_p3 = scmp.lt.s32.totalorder %s833_s6, %s833_s6 }
  0x26   : > { %p836_p11 = pnand %p834_p9, %p822_p2  ;;  %p843_p12 = por %p842_p3, %p841_p8 }
  0x28   : > { %p837_p13 = pneg %p836_p11 }
  0x2a   : > { %p844_p10 = pnand %p843_p12, %p837_p13 }
  0x2c   : > { %847 = shalt.err (!%p844_p10)
}
  0x2d   : > { %s949_s10 = smov 512   ;;  %s950_s13 = smov 32  }
  0x2e   : > { %741 = dma.hbm_to_vmem [thread:$0]  (!%p1063_p0), %s1164_s3, 8192, %s173_s11, [#allocation3], %s949_s10, %s949_s10, %s950_s13  }
  0x2f   : > { %p1175_p1 = scmp.ne.s32.totalorder %s1172_s7, 0 }
  0x30   : > { %p1176_p4 = scmp.ne.s32.totalorder (!%p1175_p1), %s1173_s8, 0 }
  0x31   : > { %199 = sbr.rel (%p1175_p1) target bundleno = 512 (0x200), region = 36 }
  0x38   : > { %909 = dma.done.wait (%p1176_p4), [#allocation3], 8192  }
  0x39   : > { %911 = vsyncadd (%p1176_p4), [#allocation3], 4294959104  ;;  %p228_p3 = scmp.lt.s32.totalorder %s934_s19, 1  ;;  %p230_p8 = scmp.lt.s32.totalorder %s930_s18, 1  ;;  %v951_v0 = vmov 0.0   ;;  %vm952_vm0 = vmmov 0  }
  0x3a   : > { %663 = vmatprep.subr.mxu0 %v951_v0  ;;  %453 = vmatprep.mubr.f32.mxu1 %v951_v0  ;;  %v953_v1 = vmov 0   ;;  %vm249_vm1 = vcmask 1043456   ;;  %v237_v2 = vld [vmem:[%s1162_s1] sm:$0xff]  ;;  %vm245_vm2 = vcmask 31744   ;;  %v326_v4 = vld [vmem:[#allocation2 + $0x8] sm:$0xff]  ;;  %v328_v7 = vld [vmem:[#allocation2 + $0x18] sm:$0xff] }
  0x3b   : > { %s229_s12 = scalar_select %p228_p3, %s934_s19, 1  ;;  %665 = vmatprep.mubr.msk.f32.mxu0 %vm952_vm0, %v951_v0  ;;  %819 = vset.pattern.permute.xlu0 %v953_v1  ;;  %v239_v3 = vld [vmem:[%s1163_s2] sm:$0xff]  ;;  %v330_v6 = vld [vmem:[#allocation2 + $0x28] sm:$0xff]  ;;  %v332_v9 = vld [vmem:[#allocation2 + $0x38] sm:$0xff] }
  0x3c   : > { %s231_s7 = scalar_select %p230_p8, %s930_s18, 1  ;;  %242 = vperm.xlu0 %819, %v239_v3   ;;  %v668_v8 = vpack.c.bf16 %v330_v6, %v326_v4  ;;  %v325_v10 = vld [vmem:[#allocation2] sm:$0xff]  ;;  %v700_v12 = vpack.c.bf16 %v332_v9, %v328_v7  ;;  %v327_v14 = vld [vmem:[#allocation2 + $0x10] sm:$0xff]  ;;  %v334_v16 = vld [vmem:[#allocation2 + $0x48] sm:$0xff] }
  0x3d   : > { %s651_s11 = sshll.u32 %s229_s12, 1  ;;  %v329_v11 = vld [vmem:[#allocation2 + $0x20] sm:$0xff]  ;;  %v331_v15 = vld [vmem:[#allocation2 + $0x30] sm:$0xff]  ;;  %v338_v18 = vld [vmem:[#allocation2 + $0x68] sm:$0xff]  ;;  %s225_s24 = sand.u32 1, %s922_s16  }
  0x3e   : > { %s233_s23 = sadd.s32 %s651_s11, %s231_s7  ;;  %v670_v13 = vpack.c.bf16 %v329_v11, %v325_v10  ;;  %669 = vmatprep.subr.bf16.mxu1 %v668_v8  ;;  %v702_v17 = vpack.c.bf16 %v331_v15, %v327_v14  ;;  %v336_v19 = vld [vmem:[#allocation2 + $0x58] sm:$0xff]  ;;  %v672_v21 = vpack.c.bf16 %v338_v18, %v334_v16  ;;  %v333_v23 = vld [vmem:[#allocation2 + $0x40] sm:$0xff]  ;;  %v335_v25 = vld [vmem:[#allocation2 + $0x50] sm:$0xff]  ;;  %s650_s12 = sshll.u32 %s225_s24, 5 }
  0x3f   : > { %s652_s28 = sshll.u32 %s233_s23, 2  ;;  %v340_v20 = vld [vmem:[#allocation2 + $0x78] sm:$0xff]  ;;  %v337_v24 = vld [vmem:[#allocation2 + $0x60] sm:$0xff]  ;;  %v339_v27 = vld [vmem:[#allocation2 + $0x70] sm:$0xff]  ;;  %s656_s7 = sshll.u32 %s930_s18, 2 }
  0x40   : > { %s235_s5 = scalar_lea.vmem %s1161_s0, %s652_s28  ;;  %671 = vmatpush1.bf16.msra.mxu1 %v670_v13  ;;  %v704_v22 = vpack.c.bf16 %v340_v20, %v336_v19  ;;  %v674_v26 = vpack.c.bf16 %v337_v24, %v333_v23  ;;  %v342_v28 = vld [vmem:[#allocation2 + $0x88] sm:$0xff]  ;;  %v706_v30 = vpack.c.bf16 %v339_v27, %v335_v25  ;;  %v344_v32 = vld [vmem:[#allocation2 + $0x98] sm:$0xff]  ;;  %v341_v34 = vld [vmem:[#allocation2 + $0x80] sm:$0xff]  ;;  %s657_s11 = sshll.u32 %s934_s19, 3 }
  0x41   : > { %v238_v5 = vld [vmem:[%s235_s5] sm:$0xf]  ;;  %v346_v29 = vld [vmem:[#allocation2 + $0xa8] sm:$0xff]  ;;  %673 = vmatprep.subr.bf16.mxu1 %v672_v21  ;;  %v348_v33 = vld [vmem:[#allocation2 + $0xb8] sm:$0xff]  ;;  %s548_s23 = sadd.s32 %s657_s11, %s656_s7  ;;  %s227_s28 = scalar_lea.vmem [#allocation5], %s650_s12 }
  0x42   : > { %664 = vmatpush3.msk.msra.mxu0 %vm249_vm1, %v238_v5  ;;  %v676_v31 = vpack.c.bf16 %v346_v29, %v342_v28  ;;  %v708_v35 = vpack.c.bf16 %v348_v33, %v344_v32  ;;  %v345_v36 = vld [vmem:[#allocation2 + $0xa0] sm:$0xff]  ;;  %v343_v37 = vld [vmem:[#allocation2 + $0x90] sm:$0xff]  ;;  %v350_v40 = vld [vmem:[#allocation2 + $0xc8] sm:$0xff]  ;;  %s552_s8 = sshll.u32 %s227_s28, 4  ;;  %s658_s27 = sshll.u32 %s548_s23, 7  ;;  %s1105_s8 = int_to_ptr.vmem [resolvable:$true] %s552_s8 }
  0x43   : > { %666 = vmatmul.mubr.msk.f32.vlgmr.msra.gmra.mrb[0].mxu0 %vm245_vm2, %v237_v2  ;;  %701 = vmatprep.subr.bf16.mxu0 %v700_v12  ;;  %v347_v38 = vld [vmem:[#allocation2 + $0xb0] sm:$0xff]  ;;  %v678_v39 = vpack.c.bf16 %v345_v36, %v341_v34  ;;  %v354_v41 = vld [vmem:[#allocation2 + $0xe8] sm:$0xff]  ;;  %v352_v42 = vld [vmem:[#allocation2 + $0xd8] sm:$0xff]  ;;  %s1110_s10 = scalar_lea.hbm %s1165_s4, %s658_s27  ;;  %s536_s18 = scalar_lea.sflag [#allocation4], %s225_s24 }
  0x44   : > { %524 = vmatprep.mubr.f32.mxu0 %v951_v0  ;;  %703 = vmatpush1.bf16.msra.mxu0 %v702_v17  ;;  %v710_v43 = vpack.c.bf16 %v347_v38, %v343_v37  ;;  %v680_v44 = vpack.c.bf16 %v354_v41, %v350_v40  ;;  %v356_v45 = vld [vmem:[#allocation2 + $0xf8] sm:$0xff]  ;;  %v349_v46 = vld [vmem:[#allocation2 + $0xc0] sm:$0xff]  ;;  %v351_v49 = vld [vmem:[#allocation2 + $0xd0] sm:$0xff]  ;;  %s848_s19 = scalar_lea.vmem %s1105_s8, 512  ;;  %p1177_p12 = scmp.ne.s32.totalorder %s1170_s29, 0 }
  0x45   : > { %705 = vmatprep.subr.bf16.mxu0 %v704_v22  ;;  %675 = vmatpush1.bf16.msra.mxu1 %v674_v26  ;;  %v353_v47 = vld [vmem:[#allocation2 + $0xe0] sm:$0xff]  ;;  %v712_v48 = vpack.c.bf16 %v356_v45, %v352_v42  ;;  %v355_v50 = vld [vmem:[#allocation2 + $0xf0] sm:$0xff]  ;;  %v358_v51 = vld [vmem:[#allocation2 + $0x108] sm:$0xff]  ;;  %p849_p10 = scmp.ne.s32.totalorder %s1105_s8, %s848_s19  ;;  %s954_s13 = smov [#allocation5]  }
  0x46   : > { %677 = vmatprep.subr.bf16.mxu1 %v676_v31  ;;  %v362_v52 = vld [vmem:[#allocation2 + $0x128] sm:$0xff]  ;;  %v360_v53 = vld [vmem:[#allocation2 + $0x118] sm:$0xff]  ;;  %v682_v55 = vpack.c.bf16 %v353_v47, %v349_v46  ;;  %v714_v56 = vpack.c.bf16 %v355_v50, %v351_v49  ;;  %v357_v58 = vld [vmem:[#allocation2 + $0x100] sm:$0xff]  ;;  %s852_s14 = sshll.u32 %s954_s13, 4  ;;  %s853_s14 = int_to_ptr.vmem [resolvable:$false] %s852_s14 }
  0x47   : > { %v364_v54 = vld [vmem:[#allocation2 + $0x138] sm:$0xff]  ;;  %v684_v57 = vpack.c.bf16 %v362_v52, %v358_v51  ;;  %v361_v59 = vld [vmem:[#allocation2 + $0x120] sm:$0xff]  ;;  %v359_v60 = vld [vmem:[#allocation2 + $0x110] sm:$0xff]  ;;  %p850_p0 = pnand %p849_p10, %p1177_p12  ;;  %s854_s12 = scalar_lea.vmem %s853_s14, 1024 }
  0x48   : > { %707 = vmatpush1.bf16.msra.mxu0 %v706_v30  ;;  %v716_v61 = vpack.c.bf16 %v364_v54, %v360_v53  ;;  %v363_v62 = vld [vmem:[#allocation2 + $0x130] sm:$0xff]  ;;  %v366_v63 = vld [vmem:[#allocation2 + $0x148] sm:$0xff]  ;;  %v368_v1 = vld [vmem:[#allocation2 + $0x158] sm:$0xff]  ;;  %v686_v3 = vpack.c.bf16 %v361_v59, %v357_v58  ;;  %p855_p5 = scmp.lt.s32.totalorder %s1105_s8, %s853_s14  ;;  %p856_p6 = scmp.lt.s32.totalorder %s854_s12, %s848_s19 }
  0x49   : > { %709 = vmatprep.subr.bf16.mxu0 %v708_v35  ;;  %679 = vmatpush1.bf16.msra.mxu1 %v678_v39  ;;  %v370_v0 = vld [vmem:[#allocation2 + $0x168] sm:$0xff]  ;;  %v372_v2 = vld [vmem:[#allocation2 + $0x178] sm:$0xff]  ;;  %v718_v4 = vpack.c.bf16 %v363_v62, %v359_v60  ;;  %v365_v6 = vld [vmem:[#allocation2 + $0x140] sm:$0xff]  ;;  %p851_p2 = pneg %p850_p0 }
  0x4a   : > { %681 = vmatprep.subr.bf16.mxu1 %v680_v44  ;;  %v688_v5 = vpack.c.bf16 %v370_v0, %v366_v63  ;;  %v369_v7 = vld [vmem:[#allocation2 + $0x160] sm:$0xff]  ;;  %v367_v8 = vld [vmem:[#allocation2 + $0x150] sm:$0xff]  ;;  %v720_v9 = vpack.c.bf16 %v372_v2, %v368_v1  ;;  %v374_v11 = vld [vmem:[#allocation2 + $0x188] sm:$0xff]  ;;  %p857_p7 = por %p856_p6, %p855_p5 }
  0x4b   : > { %v371_v10 = vld [vmem:[#allocation2 + $0x170] sm:$0xff]  ;;  %v378_v12 = vld [vmem:[#allocation2 + $0x1a8] sm:$0xff]  ;;  %v376_v13 = vld [vmem:[#allocation2 + $0x198] sm:$0xff]  ;;  %v690_v15 = vpack.c.bf16 %v369_v7, %v365_v6 }
  0x4c   : > { %711 = vmatpush1.bf16.msra.mxu0 %v710_v43  ;;  %v380_v14 = vld [vmem:[#allocation2 + $0x1b8] sm:$0xff]  ;;  %v722_v16 = vpack.c.bf16 %v371_v10, %v367_v8  ;;  %v692_v17 = vpack.c.bf16 %v378_v12, %v374_v11  ;;  %v373_v18 = vld [vmem:[#allocation2 + $0x180] sm:$0xff]  ;;  %v375_v22 = vld [vmem:[#allocation2 + $0x190] sm:$0xff]  ;;  %p858_p9 = pnand %p857_p7, %p851_p2 }
  0x4d   : > { %713 = vmatprep.subr.bf16.mxu0 %v712_v48  ;;  %683 = vmatpush1.bf16.msra.mxu1 %v682_v55  ;;  %v377_v19 = vld [vmem:[#allocation2 + $0x1a0] sm:$0xff]  ;;  %v724_v20 = vpack.c.bf16 %v380_v14, %v376_v13  ;;  %v379_v23 = vld [vmem:[#allocation2 + $0x1b0] sm:$0xff]  ;;  %v382_v25 = vld [vmem:[#allocation2 + $0x1c8] sm:$0xff] }
  0x4e   : > { %685 = vmatprep.subr.bf16.mxu1 %v684_v57  ;;  %v694_v21 = vpack.c.bf16 %v377_v19, %v373_v18  ;;  %v726_v24 = vpack.c.bf16 %v379_v23, %v375_v22  ;;  %v386_v26 = vld [vmem:[#allocation2 + $0x1e8] sm:$0xff]  ;;  %v384_v27 = vld [vmem:[#allocation2 + $0x1d8] sm:$0xff]  ;;  %v381_v30 = vld [vmem:[#allocation2 + $0x1c0] sm:$0xff] }
  0x4f   : > { %v696_v28 = vpack.c.bf16 %v386_v26, %v382_v25  ;;  %v388_v29 = vld [vmem:[#allocation2 + $0x1f8] sm:$0xff]  ;;  %v385_v31 = vld [vmem:[#allocation2 + $0x1e0] sm:$0xff]  ;;  %v383_v34 = vld [vmem:[#allocation2 + $0x1d0] sm:$0xff] }
  0x50   : > { %715 = vmatpush1.bf16.msra.mxu0 %v714_v56  ;;  %v728_v32 = vpack.c.bf16 %v388_v29, %v384_v27  ;;  %v698_v33 = vpack.c.bf16 %v385_v31, %v381_v30  ;;  %v387_v35 = vld [vmem:[#allocation2 + $0x1f0] sm:$0xff] }
  0x51   : > { %717 = vmatprep.subr.bf16.mxu0 %v716_v61  ;;  %687 = vmatpush1.bf16.msra.mxu1 %v686_v3  ;;  %v730_v36 = vpack.c.bf16 %v387_v35, %v383_v34 }
  0x52   : > { %689 = vmatprep.subr.bf16.mxu1 %v688_v5 }
  0x54   : > { %719 = vmatpush1.bf16.msra.mxu0 %v718_v4 }
  0x55   : > { %721 = vmatprep.subr.bf16.mxu0 %v720_v9  ;;  %691 = vmatpush1.bf16.msra.mxu1 %v690_v15 }
  0x56   : > { %693 = vmatprep.subr.bf16.mxu1 %v692_v17 }
  0x58   : > { %723 = vmatpush1.bf16.msra.mxu0 %v722_v16 }
  0x59   : > { %725 = vmatprep.subr.bf16.mxu0 %v724_v20  ;;  %695 = vmatpush1.bf16.msra.mxu1 %v694_v21 }
  0x5a   : > { %697 = vmatprep.subr.bf16.mxu1 %v696_v28 }
  0x5c   : > { %727 = vmatpush1.bf16.msra.mxu0 %v726_v24 }
  0x5d   : > { %729 = vmatprep.subr.bf16.mxu0 %v728_v32  ;;  %699 = vmatpush1.bf16.msra.mxu1 %v698_v33 }
  0x60   : > { %731 = vmatpush1.bf16.msra.mxu0 %v730_v36 }
  0xbb   : > { %v243_v37 = vpop.permute.xlu0 %242 }
 0x116   : > { %v319_v38 = vpop.f32.mrb[0].mxu0 }
 0x117   : > { %v320_v39 = vadd.f32 %v319_v38, %v243_v37  ;;  %v667_v40 = vpop.f32.mrb[1].mxu0 }
 0x119   : > { %v323_v41 = vmul.f32 0.1, %v320_v39 }
 0x11b   : > { %v324_v42 = vmax.f32 %v320_v39, %v323_v41 }
 0x11d   : > { %454 = vmatmul.mubr.f32.vlgmr.msra.gmra.mrb[0].mxu1 %v324_v42  ;;  %525 = vmatmul.mubr.f32.vlgmr.msra.gmra.mrb[2].mxu0 %v324_v42 }
 0x1f0   : > { %v455_v43 = vpop.f32.mrb[0].mxu1  ;;  %v526_v44 = vpop.f32.mrb[2].mxu0 }
 0x1f1   : > { %531 = vst [vmem:[%s227_s28] sm:$0xff] %v455_v43  ;;  %533 = vst [vmem:[%s227_s28 + $0x10] sm:$0xff] %v526_v44  ;;  %v457_v45 = vpop.f32.mrb[1].mxu1  ;;  %v528_v46 = vpop.f32.mrb[3].mxu0 }
 0x1f2   : > { %532 = vst [vmem:[%s227_s28 + $0x8] sm:$0xff] %v457_v45  ;;  %534 = vst [vmem:[%s227_s28 + $0x18] sm:$0xff] %v528_v46 }
 0x1f3   : > { %861 = shalt.err (!%p858_p9)
}
 0x1f4   : > { %s862_s24 = scalar_lea.hbm %s1110_s10, 512  ;;  %s866_s23 = scalar_lea.hbm %s1165_s4, 2048 }
 0x1f5   : > { %p863_p11 = scmp.ne.s32.totalorder %s1110_s10, %s862_s24  ;;  %p867_p4 = scmp.lt.u32.totalorder %s1110_s10, %s1165_s4 }
 0x1f6   : > { %p868_p3 = scmp.lt.u32.totalorder %s866_s23, %s862_s24  ;;  %p870_p10 = scmp.lt.u32.totalorder %s862_s24, %s1110_s10 }
 0x1f7   : > { %p864_p13 = pnand %p863_p11, %p1177_p12 }
 0x1f8   : > { %p869_p8 = por %p868_p3, %p867_p4 }
 0x1f9   : > { %p865_p1 = pneg %p864_p13 }
 0x1fa   : > { %p871_p0 = por %p870_p10, %p869_p8 }
 0x1fc   : > { %p872_p2 = pnand %p871_p0, %p865_p1 }
 0x1fe   : > { %875 = shalt.err (!%p872_p2)
}
 0x1ff   : > { %736 = dma.vmem_to_hbm [thread:$0]  (%p1177_p12), %s1105_s8, 512, %s1110_s10, %s536_s18  }
 0x200 PF: > { %p748_p5 = scmp.ge.s32.totalorder %s946_s22, 2  ;;  %s564_s5 = sand.u32 1, %s918_s15  }
 0x201   : > { %p1178_p6 = scmp.ne.s32.totalorder %s1171_s30, 0  ;;  %s565_s6 = scalar_lea.sflag [#allocation4], %s564_s5 }
 0x203   : > { %p743_p7 = pnand %p748_p5, %p1178_p6 }
 0x205   : > { %913 = dma.done.wait (!%p743_p7), %s565_s6, 512  }
 0x206   : > { %915 = vsyncadd (!%p743_p7), %s565_s6, 4294966784  ;;  %s18_s22 = sadd.s32 1, %s946_s22   ;;  %s1179_s15 = smov %s922_s16 }
 0x207   : > { %p15_p9 = scmp.ge.s32.totalorder %s18_s22, 6   ;;  %s1180_s16 = smov %s926_s17 }
 0x208   : > { %s1181_s17 = smov %s1059_s9  ;;  %s1182_s18 = smov %s938_s20 }
 0x209   : > { %s1183_s19 = smov %s942_s21  ;;  %s1184_s20 = smov %s1187_s25 }
 0x20a   : > { %s1185_s21 = smov %s1191_s26  ;;  %17 = sbr.rel (!%p15_p9) target bundleno = 6 (0x6), region = 76 }
 0x211   :  { %570 = vsyncpa [#allocation3], 1 }
 0x212   :  { %572 = vsyncpa [#allocation3 + $0x1], 1 }
 0x213   :  { %573 = vsyncpa [#allocation4], 1 }
 0x214   :  { %575 = vsyncpa [#allocation4 + $0x1], 1 }

</bundles_post_ra>
